<compile_context>
chip_gen: v5e
topology: v5e:2x2
jax: 0.10.0
libtpu: 0.0.40
codegen_flags: <defaults>
</compile_context>

<pallas_src>
import jax
import jax.numpy as jnp
from jax.experimental import pallas as pl
from jax.experimental.pallas import tpu as pltpu


NEG_SLOPE = 0.01      # F.leaky_relu default
NORM_EPS = 1e-12      # F.normalize default eps
LANE = 128


def _leaky_relu(x):
    # max(x, a*x) == leaky_relu(x) for 0 < a < 1 (one fewer VALU op than where/select)
    return jnp.maximum(x, NEG_SLOPE * x)


def _round_up(n, m):
    return ((n + m - 1) // m) * m


# ----------------------------- kernel --------------------------------------
def cae_kernel(x_ref, we_ref, be_ref, wd_ref, bd_ref, y_ref, bn_ref):
    # fused encoders: one (bm,3D) x (3D,Lp) matmul (block-diagonal weight)
    h = jnp.dot(x_ref[...], we_ref[...], preferred_element_type=jnp.float32)
    h = _leaky_relu(h + be_ref[...])                       # (bm, Lp), f32
    # padded cols [3L:Lp] are exactly 0 (zero weight cols + zero bias), so the
    # norm below is the norm of the real 3L-wide bottleneck.

    # L2 normalize along dim=1: x / max(||x||, eps)  ==  x * rsqrt(max(ss, eps^2))
    ss = jnp.sum(h * h, axis=1, keepdims=True)             # (bm, 1)
    inv = jax.lax.rsqrt(jnp.maximum(ss, NORM_EPS * NORM_EPS))
    bn = h * inv
    bn_ref[...] = bn                                       # lane-dense (bm, Lp) store

    # fused decoders: one (bm,Lp) x (Lp,Dp) matmul, lane-dense (bm, Dp) store
    y = jnp.dot(bn.astype(wd_ref.dtype), wd_ref[...],
                preferred_element_type=jnp.float32)
    y_ref[...] = _leaky_relu(y + bd_ref[...])


# ------------------------- one-time packing ---------------------------------
def pack_params(params, input_dim, latent_dim, matmul_dtype=jnp.float32):
    """Build fused + lane-padded operands ONCE (off the per-call path).

    params: we1..we3 (D,L), be1..be3 (1,L), wd1..wd3 (3L,D), bd1..bd3 (1,D).
    matmul_dtype: jnp.bfloat16 on v6e/v7x at scale (MXU operands only);
                  f32 accumulation and all elementwise stay f32.
    """
    D, L = input_dim, latent_dim
    Lp = _round_up(3 * L, LANE)
    Dp = _round_up(3 * D, LANE)
    f32 = jnp.float32

    # block-diagonal encoder weight (3D, Lp) and padded bias (1, Lp)
    w_enc = jnp.zeros((3 * D, Lp), f32)
    w_enc = w_enc.at[0 * D:1 * D, 0 * L:1 * L].set(params["we1"])
    w_enc = w_enc.at[1 * D:2 * D, 1 * L:2 * L].set(params["we2"])
    w_enc = w_enc.at[2 * D:3 * D, 2 * L:3 * L].set(params["we3"])
    b_enc = jnp.zeros((1, Lp), f32).at[:, :3 * L].set(
        jnp.concatenate([params["be1"], params["be2"], params["be3"]], axis=1))

    # concatenated decoder weight (Lp, Dp) (zero-padded rows/cols) and bias (1, Dp)
    w_dec = jnp.zeros((Lp, Dp), f32)
    w_dec = w_dec.at[:3 * L, 0 * D:1 * D].set(params["wd1"])
    w_dec = w_dec.at[:3 * L, 1 * D:2 * D].set(params["wd2"])
    w_dec = w_dec.at[:3 * L, 2 * D:3 * D].set(params["wd3"])
    b_dec = jnp.zeros((1, Dp), f32).at[:, :3 * D].set(
        jnp.concatenate([params["bd1"], params["bd2"], params["bd3"]], axis=1))

    return {
        "w_enc": w_enc.astype(matmul_dtype),
        "b_enc": b_enc,
        "w_dec": w_dec.astype(matmul_dtype),
        "b_dec": b_dec,
    }


# ------------------------------ wrapper --------------------------------------
def cae_forward(x1, x2, x3, packed, *, latent_dim):
    """packed: output of pack_params (built once, not per call)."""
    B, D = x1.shape
    D3 = 3 * D
    L3 = 3 * latent_dim
    Lp = packed["w_enc"].shape[1]
    Dp = packed["b_dec"].shape[1]

    x_all = jnp.concatenate([x1, x2, x3], axis=1).astype(packed["w_enc"].dtype)

    # Single-tile batch grid at toy size; for real B, pick bm ~ 256 and the
    # "parallel" axis shards across the two TensorCores on v7x.
    bm = B
    grid = (pl.cdiv(B, bm),)

    in_specs = [
        pl.BlockSpec((bm, D3), lambda i: (i, 0)),   # x_all
        pl.BlockSpec((D3, Lp), lambda i: (0, 0)),   # w_enc (weight-resident)
        pl.BlockSpec((1, Lp), lambda i: (0, 0)),    # b_enc
        pl.BlockSpec((Lp, Dp), lambda i: (0, 0)),   # w_dec
        pl.BlockSpec((1, Dp), lambda i: (0, 0)),    # b_dec
    ]
    out_specs = (
        pl.BlockSpec((bm, Dp), lambda i: (i, 0)),   # fused y1|y2|y3, lane-dense
        pl.BlockSpec((bm, Lp), lambda i: (i, 0)),   # bottleneck, lane-dense
    )
    out_shapes = (
        jax.ShapeDtypeStruct((B, Dp), jnp.float32),
        jax.ShapeDtypeStruct((B, Lp), jnp.float32),
    )

    y_all, bn_pad = pl.pallas_call(
        cae_kernel,
        grid=grid,
        in_specs=in_specs,
        out_specs=out_specs,
        out_shape=out_shapes,
        compiler_params=pltpu.CompilerParams(dimension_semantics=("parallel",)),
    )(x_all, packed["w_enc"], packed["b_enc"], packed["w_dec"], packed["b_dec"])

    y1 = y_all[:, 0 * D:1 * D]
    y2 = y_all[:, 1 * D:2 * D]
    y3 = y_all[:, 2 * D:3 * D]
    return [y1, y2, y3], bn_pad[:, :L3]


# ------------------------- init & pure-JAX reference -------------------------
def init_params(key, input_dim, latent_dim):
    """Deterministic init matching nn.init.normal_(std=0.01) weights and zero biases."""
    ks = jax.random.split(key, 6)
    p = {}
    # encoders: PyTorch weight is (latent, input); we store the transpose (input, latent)
    for i, k in zip((1, 2, 3), ks[:3]):
        w = 0.01 * jax.random.normal(k, (latent_dim, input_dim), jnp.float32)
        p[f"we{i}"] = w.T
        p[f"be{i}"] = jnp.zeros((1, latent_dim), jnp.float32)
    # decoders: PyTorch weight is (input, 3*latent); we store the transpose (3*latent, input)
    for i, k in zip((1, 2, 3), ks[3:]):
        w = 0.01 * jax.random.normal(k, (input_dim, 3 * latent_dim), jnp.float32)
        p[f"wd{i}"] = w.T
        p[f"bd{i}"] = jnp.zeros((1, input_dim), jnp.float32)
    return p


def cae_reference(x1, x2, x3, p):
    """Plain-JAX reference mirroring the PyTorch forward (sqrt-based normalize)."""
    def act(x):
        return jnp.where(x >= 0, x, NEG_SLOPE * x)
    h1 = act(x1 @ p["we1"] + p["be1"])
    h2 = act(x2 @ p["we2"] + p["be2"])
    h3 = act(x3 @ p["we3"] + p["be3"])
    cat = jnp.concatenate([h1, h2, h3], axis=1)
    norm = jnp.sqrt(jnp.sum(cat * cat, axis=1, keepdims=True))
    bn = cat / jnp.maximum(norm, NORM_EPS)
    y1 = act(bn @ p["wd1"] + p["bd1"])
    y2 = act(bn @ p["wd2"] + p["bd2"])
    y3 = act(bn @ p["wd3"] + p["bd3"])
    return [y1, y2, y3], bn


if __name__ == "__main__":
    B, D, L = 8, 32, 32  # batch, input_dim, latent_dim (small synthetic shapes)

    key = jax.random.PRNGKey(0)
    k_params, k1, k2, k3 = jax.random.split(key, 4)
    params = init_params(k_params, D, L)

    # Pack / pad weights ONCE (not on the per-call path).
    # Use matmul_dtype=jnp.bfloat16 on v6e/v7x at scale; f32 here to match
    # PyTorch numerics bit-for-bit-ish at toy size.
    packed = pack_params(params, D, L, matmul_dtype=jnp.float32)

    x1 = jax.random.normal(k1, (B, D), jnp.float32)
    x2 = jax.random.normal(k2, (B, D), jnp.float32)
    x3 = jax.random.normal(k3, (B, D), jnp.float32)

    fwd = jax.jit(cae_forward, static_argnames=("latent_dim",))
    (y1, y2, y3), bn = fwd(x1, x2, x3, packed, latent_dim=L)
    jax.block_until_ready((y1, y2, y3, bn))

    (r1, r2, r3), rbn = cae_reference(x1, x2, x3, params)
    for a, b in ((y1, r1), (y2, r2), (y3, r3), (bn, rbn)):
        assert a.shape == b.shape, "shape mismatch vs reference"
        assert jnp.allclose(a, b, atol=1e-5, rtol=1e-5), "mismatch vs reference"

    print("KERNEL_OK")
</pallas_src>

<mosaic_0001>
module attributes {stable_mosaic.version = 11 : i64} {
  func.func @cae_kernel(%arg0: i32, %arg1: memref<8x96xf32, #tpu.memory_space<vmem>>, %arg2: memref<96x128xf32, #tpu.memory_space<vmem>>, %arg3: memref<1x128xf32, #tpu.memory_space<vmem>>, %arg4: memref<128x128xf32, #tpu.memory_space<vmem>>, %arg5: memref<1x128xf32, #tpu.memory_space<vmem>>, %arg6: memref<8x128xf32, #tpu.memory_space<vmem>>, %arg7: memref<8x128xf32, #tpu.memory_space<vmem>>) attributes {dimension_semantics = [#tpu.dimension_semantics<parallel>], iteration_bounds = array<i64: 1>, scalar_prefetch = 0 : i64, scratch_operands = 0 : i64, tpu.core_type = #tpu.core_type<tc>, window_params = [{transform_indices = @transform_0, window_bounds = array<i64: 8, 96>}, {pipeline_mode = #tpu.pipeline_mode<synchronous>, transform_indices = @transform_1, window_bounds = array<i64: 96, 128>}, {pipeline_mode = #tpu.pipeline_mode<synchronous>, transform_indices = @transform_2, window_bounds = array<i64: 1, 128>}, {pipeline_mode = #tpu.pipeline_mode<synchronous>, transform_indices = @transform_3, window_bounds = array<i64: 128, 128>}, {pipeline_mode = #tpu.pipeline_mode<synchronous>, transform_indices = @transform_4, window_bounds = array<i64: 1, 128>}, {transform_indices = @transform_5, window_bounds = array<i64: 8, 128>}, {transform_indices = @transform_6, window_bounds = array<i64: 8, 128>}]} {
    %c0 = arith.constant 0 : index
    %c0_0 = arith.constant 0 : index
    %0 = vector.load %arg1[%c0, %c0_0] : memref<8x96xf32, #tpu.memory_space<vmem>>, vector<8x96xf32>
    %c0_1 = arith.constant 0 : index
    %c0_2 = arith.constant 0 : index
    %1 = vector.load %arg2[%c0_1, %c0_2] : memref<96x128xf32, #tpu.memory_space<vmem>>, vector<96x128xf32>
    %cst = arith.constant dense<0.000000e+00> : vector<8x128xf32>
    %2 = tpu.matmul %0, %1, %cst {dimension_numbers = #tpu.dot_dimension_numbers<[1], [0], [0], [1], [0, 0, 1, 1], [], []>} : vector<8x96xf32>, vector<96x128xf32>, vector<8x128xf32> -> vector<8x128xf32>
    %c0_3 = arith.constant 0 : index
    %c0_4 = arith.constant 0 : index
    %3 = vector.load %arg3[%c0_3, %c0_4] : memref<1x128xf32, #tpu.memory_space<vmem>>, vector<1x128xf32>
    %4 = vector.broadcast %3 : vector<1x128xf32> to vector<8x128xf32>
    %5 = arith.addf %2, %4 : vector<8x128xf32>
    %cst_5 = arith.constant 0.00999999977 : f32
    %6 = vector.broadcast %cst_5 : f32 to vector<8x128xf32>
    %7 = arith.mulf %6, %5 : vector<8x128xf32>
    %8 = arith.maximumf %5, %7 : vector<8x128xf32>
    %9 = arith.mulf %8, %8 : vector<8x128xf32>
    %cst_6 = arith.constant dense<0.000000e+00> : vector<8xf32>
    %10 = vector.multi_reduction <add>, %9, %cst_6 [1] : vector<8x128xf32> to vector<8xf32>
    %11 = vector.shape_cast %10 : vector<8xf32> to vector<8x1xf32>
    %cst_7 = arith.constant 1.000000e-24 : f32
    %12 = vector.broadcast %cst_7 : f32 to vector<8x1xf32>
    %13 = arith.maximumf %11, %12 : vector<8x1xf32>
    %14 = math.rsqrt %13 : vector<8x1xf32>
    %15 = vector.broadcast %14 : vector<8x1xf32> to vector<8x128xf32>
    %16 = arith.mulf %8, %15 : vector<8x128xf32>
    %c0_8 = arith.constant 0 : index
    %c0_9 = arith.constant 0 : index
    %17 = vector.load %arg7[%c0_8, %c0_9] : memref<8x128xf32, #tpu.memory_space<vmem>>, vector<8x128xf32>
    tpu.vector_store %arg7[%c0_8, %c0_9], %16 {strides = array<i32>} : memref<8x128xf32, #tpu.memory_space<vmem>>, vector<8x128xf32>,
    %c0_10 = arith.constant 0 : index
    %c0_11 = arith.constant 0 : index
    %18 = vector.load %arg4[%c0_10, %c0_11] : memref<128x128xf32, #tpu.memory_space<vmem>>, vector<128x128xf32>
    %cst_12 = arith.constant dense<0.000000e+00> : vector<8x128xf32>
    %19 = tpu.matmul %16, %18, %cst_12 {dimension_numbers = #tpu.dot_dimension_numbers<[1], [0], [0], [1], [0, 0, 1, 1], [], []>} : vector<8x128xf32>, vector<128x128xf32>, vector<8x128xf32> -> vector<8x128xf32>
    %c0_13 = arith.constant 0 : index
    %c0_14 = arith.constant 0 : index
    %20 = vector.load %arg5[%c0_13, %c0_14] : memref<1x128xf32, #tpu.memory_space<vmem>>, vector<1x128xf32>
    %21 = vector.broadcast %20 : vector<1x128xf32> to vector<8x128xf32>
    %22 = arith.addf %19, %21 : vector<8x128xf32>
    %cst_15 = arith.constant 0.00999999977 : f32
    %23 = vector.broadcast %cst_15 : f32 to vector<8x128xf32>
    %24 = arith.mulf %23, %22 : vector<8x128xf32>
    %25 = arith.maximumf %22, %24 : vector<8x128xf32>
    %c0_16 = arith.constant 0 : index
    %c0_17 = arith.constant 0 : index
    %26 = vector.load %arg6[%c0_16, %c0_17] : memref<8x128xf32, #tpu.memory_space<vmem>>, vector<8x128xf32>
    tpu.vector_store %arg6[%c0_16, %c0_17], %25 {strides = array<i32>} : memref<8x128xf32, #tpu.memory_space<vmem>>, vector<8x128xf32>,
    return
  }
  func.func @transform_0(%arg0: i32) -> (i32, i32) {
    %c0_i32 = arith.constant 0 : i32
    %c0_i32_0 = arith.constant 0 : i32
    return %arg0, %c0_i32 : i32, i32
  }
  func.func @transform_1(%arg0: i32) -> (i32, i32) {
    %c0_i32 = arith.constant 0 : i32
    %c0_i32_0 = arith.constant 0 : i32
    %c0_i32_1 = arith.constant 0 : i32
    return %c0_i32, %c0_i32_0 : i32, i32
  }
  func.func @transform_2(%arg0: i32) -> (i32, i32) {
    %c0_i32 = arith.constant 0 : i32
    %c0_i32_0 = arith.constant 0 : i32
    %c0_i32_1 = arith.constant 0 : i32
    return %c0_i32, %c0_i32_0 : i32, i32
  }
  func.func @transform_3(%arg0: i32) -> (i32, i32) {
    %c0_i32 = arith.constant 0 : i32
    %c0_i32_0 = arith.constant 0 : i32
    %c0_i32_1 = arith.constant 0 : i32
    return %c0_i32, %c0_i32_0 : i32, i32
  }
  func.func @transform_4(%arg0: i32) -> (i32, i32) {
    %c0_i32 = arith.constant 0 : i32
    %c0_i32_0 = arith.constant 0 : i32
    %c0_i32_1 = arith.constant 0 : i32
    return %c0_i32, %c0_i32_0 : i32, i32
  }
  func.func @transform_5(%arg0: i32) -> (i32, i32) {
    %c0_i32 = arith.constant 0 : i32
    %c0_i32_0 = arith.constant 0 : i32
    return %arg0, %c0_i32 : i32, i32
  }
  func.func @transform_6(%arg0: i32) -> (i32, i32) {
    %c0_i32 = arith.constant 0 : i32
    %c0_i32_0 = arith.constant 0 : i32
    return %arg0, %c0_i32 : i32, i32
  }
}

</mosaic_0001>

<bundles_post_ra>
// kernel: cae_forward.1
= control target key start
LH: loop header
LB: loop body
LE: loop exit
PB: predicated region body
PF: predicated region fallthrough
CT: control target
= control target key end

     0   :  { %12 = vsyncpa [#allocation3], 0  ;;  %s328_s0 = inlined_call_operand.vmem [shape: f32[8,96], index: 0, kind: input, shape index: {}]   ;;  %s329_s1 = inlined_call_operand.hbm [shape: f32[96,128], index: 1, kind: input, shape index: {}]   ;;  %s330_s2 = inlined_call_operand.vmem [shape: f32[1,128], index: 2, kind: input, shape index: {}]   ;;  %s331_s3 = inlined_call_operand.hbm [shape: f32[128,128], index: 3, kind: input, shape index: {}]   ;;  %s332_s4 = inlined_call_operand.vmem [shape: f32[1,128], index: 4, kind: input, shape index: {}]   ;;  %s333_s5 = inlined_call_operand.vmem [shape: f32[8,128], index: 5, kind: output, shape index: {0}]   ;;  %s334_s6 = inlined_call_operand.hbm [shape: f32[8,128], index: 6, kind: output, shape index: {1}]  }
   0x1   :  { %13 = vsyncpa [#allocation6], 0 }
   0x2   :  { %14 = vsyncpa [#allocation4], 0  ;;  %s21_s23 = sshll.u32 %s329_s1, 4  ;;  %s267_s24 = smov [#allocation2]   ;;  %s22_s23 = int_to_ptr.hbm [resolvable:$true] %s21_s23 }
   0x3   :  { %s23_s25 = sshll.u32 %s267_s24, 4  ;;  %s36_s28 = sshll.u32 %s331_s3, 4  ;;  %s24_s25 = int_to_ptr.vmem [resolvable:$true] %s23_s25  ;;  %s37_s28 = int_to_ptr.hbm [resolvable:$true] %s36_s28 }
   0x4   :  { %s268_s29 = smov 128   ;;  %s269_s30 = smov 8  }
   0x5   :  { %29 = dma.hbm_to_vmem [thread:$0]  %s22_s23, 1536, %s24_s25, [#allocation3], %s268_s29, %s268_s29, %s269_s30  }
   0x6   :  { %s270_s7 = smov [#allocation5]  }
   0x7   :  { %s38_s8 = sshll.u32 %s270_s7, 4  ;;  %s39_s8 = int_to_ptr.vmem [resolvable:$true] %s38_s8 }
   0x8   :  { %44 = dma.hbm_to_vmem [thread:$0]  %s37_s28, 2048, %s39_s8, [#allocation6], %s268_s29, %s268_s29, %s269_s30  }
   0x9   :  { %261 = dma.done.wait [#allocation3], 1536  }
   0xa   :  { %262 = vsyncadd [#allocation3], 4294965760 }
   0xb   :  { %263 = dma.done.wait [#allocation6], 2048  }
   0xc   :  { %264 = vsyncadd [#allocation6], 4294965248  ;;  %v67_v0 = vld [vmem:[#allocation2 + $0x58] sm:$0xff]  ;;  %v66_v1 = vld [vmem:[#allocation2 + $0x50] sm:$0xff]  ;;  %vm72_vm0 = vcmask 785408   ;;  %s166_s13 = sshll.u32 %s334_s6, 4  ;;  %s167_s13 = int_to_ptr.hbm [resolvable:$true] %s166_s13 }
   0xd   :  { %80 = vmatpush.msra.mxu0 %v67_v0  ;;  %v65_v2 = vld [vmem:[#allocation2 + $0x48] sm:$0xff]  ;;  %v64_v3 = vld [vmem:[#allocation2 + $0x40] sm:$0xff]  ;;  %v63_v4 = vld [vmem:[#allocation2 + $0x38] sm:$0xff] }
   0xe   :  { %v62_v5 = vld [vmem:[#allocation2 + $0x30] sm:$0xff]  ;;  %v61_v6 = vld [vmem:[#allocation2 + $0x28] sm:$0xff]  ;;  %v60_v7 = vld [vmem:[#allocation2 + $0x20] sm:$0xff] }
   0xf   :  { %81 = vmatpush.msra.mxu0 %v66_v1  ;;  %v59_v8 = vld [vmem:[#allocation2 + $0x18] sm:$0xff]  ;;  %v58_v9 = vld [vmem:[#allocation2 + $0x10] sm:$0xff]  ;;  %v57_v10 = vld [vmem:[#allocation2 + $0x8] sm:$0xff] }
  0x10   :  { %v56_v11 = vld [vmem:[#allocation2] sm:$0xff]  ;;  %v129_v13 = vld [vmem:[#allocation5 + $0x78] sm:$0xff]  ;;  %v128_v14 = vld [vmem:[#allocation5 + $0x70] sm:$0xff] }
  0x11   :  { %82 = vmatpush.msra.mxu0 %v65_v2  ;;  %v55_v12 = vld [vmem:[%s328_s0] sm:$0xff]  ;;  %134 = vmatpush.msra.mxu1 %v129_v13  ;;  %v127_v15 = vld [vmem:[#allocation5 + $0x68] sm:$0xff]  ;;  %v125_v23 = vld [vmem:[#allocation5 + $0x58] sm:$0xff]  ;;  %s271_s0 = smov [#allocation7]  }
  0x12   :  { %v126_v16 = vld [vmem:[#allocation5 + $0x60] sm:$0xff]  ;;  %v124_v24 = vld [vmem:[#allocation5 + $0x50] sm:$0xff]  ;;  %v123_v25 = vld [vmem:[#allocation5 + $0x48] sm:$0xff] }
  0x13   :  { %83 = vmatpush.msra.mxu0 %v64_v3  ;;  %135 = vmatpush.msra.mxu1 %v128_v14  ;;  %v185_v17 = vld [vmem:[%s330_s2] ss:$0 sm:$0xff]  ;;  %v121_v27 = vld [vmem:[#allocation5 + $0x38] sm:$0xff]  ;;  %v120_v28 = vld [vmem:[#allocation5 + $0x30] sm:$0xff]  ;;  %s164_s2 = sshll.u32 %s271_s0, 4  ;;  %s165_s2 = int_to_ptr.vmem [resolvable:$true] %s164_s2 }
  0x14   :  { %v122_v26 = vld [vmem:[#allocation5 + $0x40] sm:$0xff]  ;;  %v119_v29 = vld [vmem:[#allocation5 + $0x28] sm:$0xff]  ;;  %v117_v31 = vld [vmem:[#allocation5 + $0x18] sm:$0xff] }
  0x15   :  { %84 = vmatpush.msra.mxu0 %v63_v4  ;;  %136 = vmatpush.msra.mxu1 %v127_v15  ;;  %v118_v30 = vld [vmem:[#allocation5 + $0x20] sm:$0xff]  ;;  %v116_v32 = vld [vmem:[#allocation5 + $0x10] sm:$0xff]  ;;  %v115_v33 = vld [vmem:[#allocation5 + $0x8] sm:$0xff] }
  0x16   :  { %v114_v34 = vld [vmem:[#allocation5] sm:$0xff] }
  0x17   :  { %85 = vmatpush.msra.mxu0 %v62_v5  ;;  %137 = vmatpush.msra.mxu1 %v126_v16  ;;  %v186_v45 = vld [vmem:[%s332_s4] ss:$0 sm:$0xff] }
  0x19   :  { %86 = vmatpush.msra.mxu0 %v61_v6  ;;  %138 = vmatpush.msra.mxu1 %v125_v23 }
  0x1b   :  { %87 = vmatpush.msra.mxu0 %v60_v7  ;;  %139 = vmatpush.msra.mxu1 %v124_v24 }
  0x1d   :  { %88 = vmatpush.msra.mxu0 %v59_v8  ;;  %140 = vmatpush.msra.mxu1 %v123_v25 }
  0x1f   :  { %89 = vmatpush.msra.mxu0 %v58_v9  ;;  %141 = vmatpush.msra.mxu1 %v122_v26 }
  0x21   :  { %90 = vmatpush.msra.mxu0 %v57_v10  ;;  %142 = vmatpush.msra.mxu1 %v121_v27 }
  0x23   :  { %91 = vmatpush.msra.mxu0 %v56_v11  ;;  %143 = vmatpush.msra.mxu1 %v120_v28 }
  0x24   :  { %179 = vmatmul.msk.f32.vlgmr.msra.gmra.mxu0 %vm72_vm0, %v55_v12 }
  0x25   :  { %144 = vmatpush.msra.mxu1 %v119_v29 }
  0x27   :  { %145 = vmatpush.msra.mxu1 %v118_v30 }
  0x29   :  { %146 = vmatpush.msra.mxu1 %v117_v31 }
  0x2b   :  { %147 = vmatpush.msra.mxu1 %v116_v32 }
  0x2d   :  { %148 = vmatpush.msra.mxu1 %v115_v33 }
  0x2f   :  { %149 = vmatpush.msra.mxu1 %v114_v34 }
  0xa1   :  { %v93_v18 = vpop.f32.mrf.mxu0 }
  0xa2   :  { %v94_v19 = vadd.f32 %v185_v17, %v93_v18 }
  0xa4   :  { %v96_v20 = vmul.f32 0.01, %v94_v19 }
  0xa6   :  { %v97_v21 = vmax.f32 %v94_v19, %v96_v20 }
  0xa8   :  { %v98_v22 = vmul.f32 %v97_v21, %v97_v21 }
  0xaa   :  { %99 = vadd.xlane.f32.xlu0 %v98_v22 }
 0x11d   :  { %v100_v35 = vpop.xlane.xlu0 %99 }
 0x11e   :  { %v101_v36 = vmax.f32 %v100_v35, 1e-24 }
 0x120   :  { %187 = vrsqrt.f32 %v101_v36  ;;  %vm108_vm2 = vweird.f32 %v101_v36 }
 0x126   :  { %v188_v37 = vpop.eup %187 }
 0x127   :  { %v103_v38 = vmul.f32 %v188_v37, %v101_v36  ;;  %vm109_vm1 = vweird.f32 %v188_v37 }
 0x128   :  { %vm110_vm3 = vmor %vm108_vm2, %vm109_vm1 }
 0x129   :  { %v104_v39 = vmul.f32 %v188_v37, %v103_v38 }
 0x12b   :  { %v105_v40 = vmul.f32 0.5, %v104_v39 }
 0x12d   :  { %v106_v41 = vsub.f32 1.5, %v105_v40 }
 0x12f   :  { %v107_v42 = vmul.f32 %v188_v37, %v106_v41 }
 0x131   :  { %v111_v43 = vsel %vm110_vm3, %v188_v37, %v107_v42 }
 0x132   :  { %v112_v44 = vmul.f32 %v111_v43, %v97_v21 }
 0x134   :  { %150 = vmatmul.f32.vlgmr.msra.gmra.mxu1 %v112_v44  ;;  %113 = vst [vmem:[#allocation7] sm:$0xff] %v112_v44 }
 0x135   :  { %169 = dma.vmem_to_hbm [thread:$0]  %s165_s2, 128, %s167_s13, [#allocation4]  }
 0x1b1   :  { %v151_v46 = vpop.f32.mrf.mxu1 }
 0x1b2   :  { %v152_v47 = vadd.f32 %v186_v45, %v151_v46 }
 0x1b4   :  { %v154_v48 = vmul.f32 0.01, %v152_v47 }
 0x1b6   :  { %v155_v49 = vmax.f32 %v152_v47, %v154_v48 }
 0x1b8   :  { %156 = vst [vmem:[%s333_s5] sm:$0xff] %v155_v49 }
 0x1b9   :  { %265 = dma.done.wait [#allocation4], 128  }
 0x1ba   :  { %266 = vsyncadd [#allocation4], 4294967168 }
 0x1bb   :  { %176 = vsyncpa [#allocation3], 1 }
 0x1bc   :  { %177 = vsyncpa [#allocation6], 1 }
 0x1bd   :  { %178 = vsyncpa [#allocation4], 1 }

</bundles_post_ra>
